<compile_context>
chip_gen: v7x
topology: tpu7x:2x2x1
jax: 0.10.0
libtpu: 0.0.40
codegen_flags: <defaults>
</compile_context>

<pallas_src>
import math

import jax
import jax.numpy as jnp
from jax import lax
from jax.experimental import pallas as pl
from jax.experimental.pallas import tpu as pltpu


# Abramowitz & Stegun 4.4.46: acos(x) ~= sqrt(1-x) * poly7(x) on [0, 1],
# |error| <= 2e-8.  Negative x handled via acos(x) = pi - acos(-x).
_ACOS_COEFFS = (
    1.5707963050, -0.2145988016, 0.0889789874, -0.0501743046,
    0.0308918810, -0.0170881256, 0.0066700901, -0.0012624911,
)


def _acos_f32(x):
    a = jnp.abs(x)
    p = jnp.float32(_ACOS_COEFFS[-1])
    for c in reversed(_ACOS_COEFFS[:-1]):
        p = p * a + jnp.float32(c)
    r = jnp.sqrt(1.0 - a) * p
    return jnp.where(x >= 0, r, jnp.float32(math.pi) - r)


def l_color_zy(x, y, *, tile_cap=8192):
    """Cosine-angle color loss. x, y: (N, C, H, W), any float dtype. Returns scalar."""
    assert x.shape == y.shape
    N, C, H, W = x.shape
    HW = H * W
    assert tile_cap % 128 == 0

    # Lane tile over the spatial axis: full extent if it fits, else a
    # 128-aligned tile (kept small enough that 2 inputs x 2 buffers x 8-padded
    # sublanes stays well under every generation's scoped-VMEM default).
    T = HW if HW <= tile_cap else tile_cap
    num_tiles = pl.cdiv(HW, T)
    need_mask = (HW % T) != 0

    x3 = x.reshape(N, C, HW)  # keep native dtype; cast to f32 inside the kernel
    y3 = y.reshape(N, C, HW)

    def kernel(x_ref, y_ref, s1_ref, s2_ref):
        j = pl.program_id(1)

        @pl.when(j == 0)
        def _():
            s1_ref[...] = jnp.zeros_like(s1_ref)
            s2_ref[...] = jnp.zeros_like(s2_ref)

        xt = x_ref[...].astype(jnp.float32)  # (1, C, T)
        yt = y_ref[...].astype(jnp.float32)

        # Unrolled channel reduction (C is small): stays on the VPU, avoids the
        # cross-sublane XLU reduce and the 8-sublane padding of the operands.
        xc = xt[:, 0:1, :]
        yc = yt[:, 0:1, :]
        s_xy = xc * yc
        s_xx = xc * xc
        s_yy = yc * yc
        for c in range(1, C):
            xc = xt[:, c:c + 1, :]
            yc = yt[:, c:c + 1, :]
            s_xy = s_xy + xc * yc
            s_xx = s_xx + xc * xc
            s_yy = s_yy + yc * yc

        inv_c = jnp.float32(1.0 / C)
        # Single sqrt for the denominator; exact divide (acos is sensitive near 1).
        denom = jnp.sqrt((s_xx * inv_c) * (s_yy * inv_c)) + jnp.float32(1e-5)
        cos = (s_xy * inv_c) / denom  # (1, 1, T)

        if need_mask:
            lane = lax.broadcasted_iota(jnp.int32, cos.shape, 2)
            valid = (j * T + lane) < HW
            # Padded lanes -> cos = 1, contributing exactly 0 to both sums.
            cos = jnp.where(valid, cos, jnp.float32(1.0))

        s1_ref[...] += jnp.float32(1.0) - cos
        s2_ref[...] += _acos_f32(cos)

    flops = N * HW * (6 * C + 25)
    bytes_accessed = 2 * N * C * HW * x.dtype.itemsize + 2 * N * T * 4
    cost = pl.CostEstimate(
        flops=flops,
        transcendentals=2 * N * HW,
        bytes_accessed=bytes_accessed,
    )

    s1, s2 = pl.pallas_call(
        kernel,
        out_shape=(
            jax.ShapeDtypeStruct((N, 1, T), jnp.float32),
            jax.ShapeDtypeStruct((N, 1, T), jnp.float32),
        ),
        grid=(N, num_tiles),
        in_specs=[
            pl.BlockSpec((1, C, T), lambda n, j: (n, 0, j)),
            pl.BlockSpec((1, C, T), lambda n, j: (n, 0, j)),
        ],
        out_specs=(
            pl.BlockSpec((1, 1, T), lambda n, j: (n, 0, 0)),
            pl.BlockSpec((1, 1, T), lambda n, j: (n, 0, 0)),
        ),
        compiler_params=pltpu.CompilerParams(
            dimension_semantics=("parallel", "arbitrary"),
        ),
        cost_estimate=cost,
    )(x3, y3)

    # Tiny epilogue: sum the per-batch lane partials and normalize.
    return (jnp.sum(s1) + jnp.sum(s2)) / jnp.float32(N * HW)


def _reference(x, y):
    prod = jnp.mean(x * y, axis=1, keepdims=True)
    x_abs = jnp.sqrt(jnp.mean(x * x, axis=1, keepdims=True))
    y_abs = jnp.sqrt(jnp.mean(y * y, axis=1, keepdims=True))
    cos = prod / (x_abs * y_abs + 1e-5)
    return jnp.mean(1.0 - cos) + jnp.mean(jnp.arccos(cos))


if __name__ == "__main__":
    key = jax.random.PRNGKey(0)
    kx, ky, kz = jax.random.split(key, 3)

    # Small NCHW shapes consistent with the module.
    N, C, H, W = 2, 4, 16, 16
    x = jax.random.uniform(kx, (N, C, H, W), dtype=jnp.float32)
    y = jax.random.uniform(ky, (N, C, H, W), dtype=jnp.float32)

    loss = jax.block_until_ready(jax.jit(l_color_zy)(x, y))
    ref = _reference(x, y)
    assert jnp.allclose(loss, ref, rtol=1e-5, atol=1e-5), (loss, ref)

    # Exercise the tiled + masked-remainder path with a small tile cap
    # (HW = 300 -> 3 tiles of 128, last tile padded and masked).
    H2, W2 = 15, 20
    x2 = jax.random.uniform(kx, (N, C, H2, W2), dtype=jnp.float32)
    y2 = jax.random.uniform(kz, (N, C, H2, W2), dtype=jnp.float32)
    loss2 = jax.block_until_ready(
        jax.jit(lambda a, b: l_color_zy(a, b, tile_cap=128))(x2, y2))
    ref2 = _reference(x2, y2)
    assert jnp.allclose(loss2, ref2, rtol=1e-5, atol=1e-5), (loss2, ref2)

    # Near x == y (cos -> 1): the most acos-sensitive regime; slightly looser
    # tolerance since the kernel fuses sqrt(mx*my) and sums in a different order.
    y3 = jnp.clip(x + 1e-3 * jax.random.normal(kz, x.shape, dtype=jnp.float32), 0.0, 1.0)
    loss3 = jax.block_until_ready(jax.jit(l_color_zy)(x, y3))
    ref3 = _reference(x, y3)
    assert jnp.allclose(loss3, ref3, rtol=1e-4, atol=1e-4), (loss3, ref3)

    print("KERNEL_OK")
</pallas_src>

<mosaic_0001>
module attributes {stable_mosaic.version = 11 : i64} {
  func.func @kernel(%arg0: i32, %arg1: i32, %arg2: memref<1x4x256xf32, #tpu.memory_space<vmem>>, %arg3: memref<1x4x256xf32, #tpu.memory_space<vmem>>, %arg4: memref<1x1x256xf32, #tpu.memory_space<vmem>>, %arg5: memref<1x1x256xf32, #tpu.memory_space<vmem>>) attributes {dimension_semantics = [#tpu.dimension_semantics<parallel>, #tpu.dimension_semantics<arbitrary>], iteration_bounds = array<i64: 2, 1>, scalar_prefetch = 0 : i64, scratch_operands = 0 : i64, tpu.core_type = #tpu.core_type<tc>, window_params = [{transform_indices = @transform_0, window_bounds = array<i64: 1, 4, 256>}, {transform_indices = @transform_1, window_bounds = array<i64: 1, 4, 256>}, {transform_indices = @transform_2, window_bounds = array<i64: 1, 1, 256>}, {transform_indices = @transform_3, window_bounds = array<i64: 1, 1, 256>}]} {
    %c0_i32 = arith.constant 0 : i32
    %0 = arith.cmpi eq, %arg1, %c0_i32 : i32
    %1 = arith.extui %0 : i1 to i32
    %c0_i32_0 = arith.constant 0 : i32
    %2 = arith.cmpi ne, %1, %c0_i32_0 : i32
    scf.if %2 {
      %cst_33 = arith.constant 0.000000e+00 : f32
      %85 = vector.broadcast %cst_33 : f32 to vector<1x1x256xf32>
      %c0_34 = arith.constant 0 : index
      %c0_35 = arith.constant 0 : index
      %c0_36 = arith.constant 0 : index
      %86 = vector.load %arg4[%c0_34, %c0_35, %c0_36] : memref<1x1x256xf32, #tpu.memory_space<vmem>>, vector<1x1x256xf32>
      tpu.vector_store %arg4[%c0_34, %c0_35, %c0_36], %85 {strides = array<i32>} : memref<1x1x256xf32, #tpu.memory_space<vmem>>, vector<1x1x256xf32>,
      %cst_37 = arith.constant 0.000000e+00 : f32
      %87 = vector.broadcast %cst_37 : f32 to vector<1x1x256xf32>
      %c0_38 = arith.constant 0 : index
      %c0_39 = arith.constant 0 : index
      %c0_40 = arith.constant 0 : index
      %88 = vector.load %arg5[%c0_38, %c0_39, %c0_40] : memref<1x1x256xf32, #tpu.memory_space<vmem>>, vector<1x1x256xf32>
      tpu.vector_store %arg5[%c0_38, %c0_39, %c0_40], %87 {strides = array<i32>} : memref<1x1x256xf32, #tpu.memory_space<vmem>>, vector<1x1x256xf32>,
    } else {
    }
    %c0 = arith.constant 0 : index
    %c0_1 = arith.constant 0 : index
    %c0_2 = arith.constant 0 : index
    %3 = vector.load %arg2[%c0, %c0_1, %c0_2] : memref<1x4x256xf32, #tpu.memory_space<vmem>>, vector<1x4x256xf32>
    %c0_3 = arith.constant 0 : index
    %c0_4 = arith.constant 0 : index
    %c0_5 = arith.constant 0 : index
    %4 = vector.load %arg3[%c0_3, %c0_4, %c0_5] : memref<1x4x256xf32, #tpu.memory_space<vmem>>, vector<1x4x256xf32>
    %5 = vector.extract_strided_slice %3 {offsets = [0, 0, 0], sizes = [1, 1, 256], strides = [1, 1, 1]} : vector<1x4x256xf32> to vector<1x1x256xf32>
    %6 = vector.extract_strided_slice %4 {offsets = [0, 0, 0], sizes = [1, 1, 256], strides = [1, 1, 1]} : vector<1x4x256xf32> to vector<1x1x256xf32>
    %7 = arith.mulf %5, %6 : vector<1x1x256xf32>
    %8 = arith.mulf %5, %5 : vector<1x1x256xf32>
    %9 = arith.mulf %6, %6 : vector<1x1x256xf32>
    %10 = vector.extract_strided_slice %3 {offsets = [0, 1, 0], sizes = [1, 1, 256], strides = [1, 1, 1]} : vector<1x4x256xf32> to vector<1x1x256xf32>
    %11 = vector.extract_strided_slice %4 {offsets = [0, 1, 0], sizes = [1, 1, 256], strides = [1, 1, 1]} : vector<1x4x256xf32> to vector<1x1x256xf32>
    %12 = arith.mulf %10, %11 : vector<1x1x256xf32>
    %13 = arith.addf %7, %12 : vector<1x1x256xf32>
    %14 = arith.mulf %10, %10 : vector<1x1x256xf32>
    %15 = arith.addf %8, %14 : vector<1x1x256xf32>
    %16 = arith.mulf %11, %11 : vector<1x1x256xf32>
    %17 = arith.addf %9, %16 : vector<1x1x256xf32>
    %18 = vector.extract_strided_slice %3 {offsets = [0, 2, 0], sizes = [1, 1, 256], strides = [1, 1, 1]} : vector<1x4x256xf32> to vector<1x1x256xf32>
    %19 = vector.extract_strided_slice %4 {offsets = [0, 2, 0], sizes = [1, 1, 256], strides = [1, 1, 1]} : vector<1x4x256xf32> to vector<1x1x256xf32>
    %20 = arith.mulf %18, %19 : vector<1x1x256xf32>
    %21 = arith.addf %13, %20 : vector<1x1x256xf32>
    %22 = arith.mulf %18, %18 : vector<1x1x256xf32>
    %23 = arith.addf %15, %22 : vector<1x1x256xf32>
    %24 = arith.mulf %19, %19 : vector<1x1x256xf32>
    %25 = arith.addf %17, %24 : vector<1x1x256xf32>
    %26 = vector.extract_strided_slice %3 {offsets = [0, 3, 0], sizes = [1, 1, 256], strides = [1, 1, 1]} : vector<1x4x256xf32> to vector<1x1x256xf32>
    %27 = vector.extract_strided_slice %4 {offsets = [0, 3, 0], sizes = [1, 1, 256], strides = [1, 1, 1]} : vector<1x4x256xf32> to vector<1x1x256xf32>
    %28 = arith.mulf %26, %27 : vector<1x1x256xf32>
    %29 = arith.addf %21, %28 : vector<1x1x256xf32>
    %30 = arith.mulf %26, %26 : vector<1x1x256xf32>
    %31 = arith.addf %23, %30 : vector<1x1x256xf32>
    %32 = arith.mulf %27, %27 : vector<1x1x256xf32>
    %33 = arith.addf %25, %32 : vector<1x1x256xf32>
    %cst = arith.constant 2.500000e-01 : f32
    %34 = vector.broadcast %cst : f32 to vector<1x1x256xf32>
    %35 = arith.mulf %31, %34 : vector<1x1x256xf32>
    %cst_6 = arith.constant 2.500000e-01 : f32
    %36 = vector.broadcast %cst_6 : f32 to vector<1x1x256xf32>
    %37 = arith.mulf %33, %36 : vector<1x1x256xf32>
    %38 = arith.mulf %35, %37 : vector<1x1x256xf32>
    %39 = math.sqrt %38 : vector<1x1x256xf32>
    %cst_7 = arith.constant 9.99999974E-6 : f32
    %40 = vector.broadcast %cst_7 : f32 to vector<1x1x256xf32>
    %41 = arith.addf %39, %40 : vector<1x1x256xf32>
    %cst_8 = arith.constant 2.500000e-01 : f32
    %42 = vector.broadcast %cst_8 : f32 to vector<1x1x256xf32>
    %43 = arith.mulf %29, %42 : vector<1x1x256xf32>
    %44 = arith.divf %43, %41 : vector<1x1x256xf32>
    %c0_9 = arith.constant 0 : index
    %c0_10 = arith.constant 0 : index
    %c0_11 = arith.constant 0 : index
    %45 = vector.load %arg4[%c0_9, %c0_10, %c0_11] : memref<1x1x256xf32, #tpu.memory_space<vmem>>, vector<1x1x256xf32>
    %cst_12 = arith.constant 1.000000e+00 : f32
    %46 = vector.broadcast %cst_12 : f32 to vector<1x1x256xf32>
    %47 = arith.subf %46, %44 : vector<1x1x256xf32>
    %48 = arith.addf %45, %47 : vector<1x1x256xf32>
    %c0_13 = arith.constant 0 : index
    %c0_14 = arith.constant 0 : index
    %c0_15 = arith.constant 0 : index
    %49 = vector.load %arg4[%c0_13, %c0_14, %c0_15] : memref<1x1x256xf32, #tpu.memory_space<vmem>>, vector<1x1x256xf32>
    tpu.vector_store %arg4[%c0_13, %c0_14, %c0_15], %48 {strides = array<i32>} : memref<1x1x256xf32, #tpu.memory_space<vmem>>, vector<1x1x256xf32>,
    %c0_16 = arith.constant 0 : index
    %c0_17 = arith.constant 0 : index
    %c0_18 = arith.constant 0 : index
    %50 = vector.load %arg5[%c0_16, %c0_17, %c0_18] : memref<1x1x256xf32, #tpu.memory_space<vmem>>, vector<1x1x256xf32>
    %51 = math.absf %44 : vector<1x1x256xf32>
    %cst_19 = arith.constant -0.0012624911 : f32
    %52 = vector.broadcast %cst_19 : f32 to vector<1x1x256xf32>
    %53 = arith.mulf %52, %51 : vector<1x1x256xf32>
    %cst_20 = arith.constant 6.670090e-03 : f32
    %54 = vector.broadcast %cst_20 : f32 to vector<1x1x256xf32>
    %55 = arith.addf %53, %54 : vector<1x1x256xf32>
    %56 = arith.mulf %55, %51 : vector<1x1x256xf32>
    %cst_21 = arith.constant -0.0170881264 : f32
    %57 = vector.broadcast %cst_21 : f32 to vector<1x1x256xf32>
    %58 = arith.addf %56, %57 : vector<1x1x256xf32>
    %59 = arith.mulf %58, %51 : vector<1x1x256xf32>
    %cst_22 = arith.constant 0.0308918804 : f32
    %60 = vector.broadcast %cst_22 : f32 to vector<1x1x256xf32>
    %61 = arith.addf %59, %60 : vector<1x1x256xf32>
    %62 = arith.mulf %61, %51 : vector<1x1x256xf32>
    %cst_23 = arith.constant -0.0501743034 : f32
    %63 = vector.broadcast %cst_23 : f32 to vector<1x1x256xf32>
    %64 = arith.addf %62, %63 : vector<1x1x256xf32>
    %65 = arith.mulf %64, %51 : vector<1x1x256xf32>
    %cst_24 = arith.constant 0.0889789909 : f32
    %66 = vector.broadcast %cst_24 : f32 to vector<1x1x256xf32>
    %67 = arith.addf %65, %66 : vector<1x1x256xf32>
    %68 = arith.mulf %67, %51 : vector<1x1x256xf32>
    %cst_25 = arith.constant -0.214598805 : f32
    %69 = vector.broadcast %cst_25 : f32 to vector<1x1x256xf32>
    %70 = arith.addf %68, %69 : vector<1x1x256xf32>
    %71 = arith.mulf %70, %51 : vector<1x1x256xf32>
    %cst_26 = arith.constant 1.57079625 : f32
    %72 = vector.broadcast %cst_26 : f32 to vector<1x1x256xf32>
    %73 = arith.addf %71, %72 : vector<1x1x256xf32>
    %cst_27 = arith.constant 1.000000e+00 : f32
    %74 = vector.broadcast %cst_27 : f32 to vector<1x1x256xf32>
    %75 = arith.subf %74, %51 : vector<1x1x256xf32>
    %76 = math.sqrt %75 : vector<1x1x256xf32>
    %77 = arith.mulf %76, %73 : vector<1x1x256xf32>
    %cst_28 = arith.constant 0.000000e+00 : f32
    %78 = vector.broadcast %cst_28 : f32 to vector<1x1x256xf32>
    %79 = arith.cmpf oge, %44, %78 : vector<1x1x256xf32>
    %cst_29 = arith.constant 3.14159274 : f32
    %80 = vector.broadcast %cst_29 : f32 to vector<1x1x256xf32>
    %81 = arith.subf %80, %77 : vector<1x1x256xf32>
    %82 = arith.select %79, %77, %81 : vector<1x1x256xi1>, vector<1x1x256xf32>
    %83 = arith.addf %50, %82 : vector<1x1x256xf32>
    %c0_30 = arith.constant 0 : index
    %c0_31 = arith.constant 0 : index
    %c0_32 = arith.constant 0 : index
    %84 = vector.load %arg5[%c0_30, %c0_31, %c0_32] : memref<1x1x256xf32, #tpu.memory_space<vmem>>, vector<1x1x256xf32>
    tpu.vector_store %arg5[%c0_30, %c0_31, %c0_32], %83 {strides = array<i32>} : memref<1x1x256xf32, #tpu.memory_space<vmem>>, vector<1x1x256xf32>,
    return
  }
  func.func @transform_0(%arg0: i32, %arg1: i32) -> (i32, i32, i32) {
    %c0_i32 = arith.constant 0 : i32
    %c0_i32_0 = arith.constant 0 : i32
    return %arg0, %c0_i32, %arg1 : i32, i32, i32
  }
  func.func @transform_1(%arg0: i32, %arg1: i32) -> (i32, i32, i32) {
    %c0_i32 = arith.constant 0 : i32
    %c0_i32_0 = arith.constant 0 : i32
    return %arg0, %c0_i32, %arg1 : i32, i32, i32
  }
  func.func @transform_2(%arg0: i32, %arg1: i32) -> (i32, i32, i32) {
    %c0_i32 = arith.constant 0 : i32
    %c0_i32_0 = arith.constant 0 : i32
    %c0_i32_1 = arith.constant 0 : i32
    return %arg0, %c0_i32, %c0_i32_0 : i32, i32, i32
  }
  func.func @transform_3(%arg0: i32, %arg1: i32) -> (i32, i32, i32) {
    %c0_i32 = arith.constant 0 : i32
    %c0_i32_0 = arith.constant 0 : i32
    %c0_i32_1 = arith.constant 0 : i32
    return %arg0, %c0_i32, %c0_i32_0 : i32, i32, i32
  }
}

</mosaic_0001>

<bundles_post_ra>
// kernel: l_color_zy.1
= control target key start
LH: loop header
LB: loop body
LE: loop exit
PB: predicated region body
PF: predicated region fallthrough
CT: control target
= control target key end

     0   :  { %s600_s12 = smov 0   ;;  %s602_s13 = smov 0   ;;  %s661_s0 = inlined_call_operand.vmem [shape: f32[2,4,256], index: 0, kind: input, shape index: {}]   ;;  %s662_s1 = inlined_call_operand.vmem [shape: f32[2,4,256], index: 1, kind: input, shape index: {}]   ;;  %s663_s2 = inlined_call_operand.vmem [shape: f32[2,1,256], index: 2, kind: output, shape index: {0}]   ;;  %s664_s3 = inlined_call_operand.vmem [shape: f32[2,1,256], index: 3, kind: output, shape index: {1}]  }
   0x1   :  { %s604_s14 = smov 0  }
   0x2 LB: > { %s26_s15 = sadd.s32 1, %s572_s13  ;;  %p502_p0 = scmp.ge.s32.totalorder %s576_s14, 1  ;;  %s576_s14 = sphi %s604_s14, %s14_s14   ;;  %s572_s13 = sphi %s602_s13, %s668_s13   ;;  %s568_s12 = sphi %s600_s12, %s667_s12  }
   0x3   : > { %p28_p1 = scmp.ge.s32.totalorder %s26_s15, 2  ;;  %p176_p2 = scmp.lt.s32.totalorder %s576_s14, 3 }
   0x5   : > { %s670_s15 = smov (%p28_p1, %s26_s15), 0  ;;  %p177_p3 = pnand %p502_p0, %p176_p2 }
   0x6   : > { %p217_p4 = scmp.lt.s32.totalorder (!%p177_p3), %s568_s12, 1  ;;  %v248_v0 = vlaneseq (!%p177_p3)  ;;  %v578_v4 = vmov (!%p177_p3), 0.0   ;;  %v579_v35 = vmov (!%p177_p3), 1966171168  }
   0x7   : > { %180 = sbr.rel (%p177_p3) target bundleno = 105 (0x69), region = 28  ;;  %v316_v36 = vunpack.c.l.s4 (!%p177_p3), %v579_v35 }
   0x8   : > { %vm618_vm0 = vcmp.lt.s32.totalorder (!%p177_p3), %v248_v0, 256  ;;  %v319_v39 = vshrl.u32 (!%p177_p3), %v248_v0, 7 }
   0x9   : > { %v317_v38 = vunpack.c.0.s8 (!%p177_p3), %v316_v36 }
   0xb   : > { %v320_v42 = vsub.s32 (!%p177_p3), %v317_v38, %v319_v39 }
   0xe   : > { %s672_s12 = smov (!%p217_p4, %s568_s12), 1 }
   0xf   : > { %s520_s16 = sshll.u32 %s672_s12, 3  ;;  %s507_s17 = sshll.u32 %s672_s12, 1 }
  0x10   : > { %s224_s20 = scalar_lea.vmem %s661_s0, %s520_s16  ;;  %s234_s23 = scalar_lea.vmem %s662_s1, %s520_s16 }
  0x11   : > { %s631_s26 = scalar_lea.vmem %s663_s2, %s507_s17  ;;  %v254_v2 = vld [vmem:[%s224_s20] sm:$0xff]  ;;  %s636_s29 = scalar_lea.vmem %s664_s3, %s507_s17 }
  0x12   : > { %v255_v3 = vld [vmem:[%s234_s23] sm:$0xff]  ;;  %252 = vst.msk [vmem:[%s631_s26] sm:$0x3] %vm618_vm0, %v578_v4  ;;  %v257_v5 = vmul.f32 %v254_v2, %v254_v2  ;;  %253 = vst.msk [vmem:[%s636_s29] sm:$0x3] %vm618_vm0, %v578_v4 }
  0x13   : > { %v258_v6 = vmul.f32 %v255_v3, %v255_v3  ;;  %v256_v22 = vmul.f32 %v255_v3, %v254_v2 }
  0x14   : > { %v510_v7 = vrot.slane %v257_v5, 9  ;;  %v513_v9 = vrot.slane %v257_v5, 10  ;;  %v516_v13 = vrot.slane %v257_v5, 11 }
  0x15   : > { %v511_v8 = vrot.slane %v258_v6, 9  ;;  %v514_v10 = vrot.slane %v258_v6, 10  ;;  %v517_v14 = vrot.slane %v258_v6, 11  ;;  %v509_v23 = vrot.slane %v256_v22, 9 }
  0x16   : > { %v268_v11 = vadd.f32 %v510_v7, %v257_v5  ;;  %v512_v28 = vrot.slane %v256_v22, 10  ;;  %v515_v33 = vrot.slane %v256_v22, 11 }
  0x17   : > { %v273_v12 = vadd.f32 %v511_v8, %v258_v6  ;;  %v263_v27 = vadd.f32 %v509_v23, %v256_v22 }
  0x18   : > { %v281_v15 = vadd.f32 %v513_v9, %v268_v11 }
  0x19   : > { %v285_v16 = vadd.f32 %v514_v10, %v273_v12  ;;  %v277_v32 = vadd.f32 %v512_v28, %v263_v27  ;;  %v312_v47 = vld [vmem:[%s631_s26] sm:$0x3] }
  0x1a   : > { %v293_v17 = vadd.f32 %v516_v13, %v281_v15  ;;  %v336_v10 = vld [vmem:[%s636_s29] sm:$0x3] }
  0x1b   : > { %v297_v18 = vadd.f32 %v517_v14, %v285_v16  ;;  %v289_v34 = vadd.f32 %v515_v33, %v277_v32 }
  0x1c   : > { %v298_v19 = vmul.f32 0.25, %v293_v17 }
  0x1d   : > { %v299_v20 = vmul.f32 0.25, %v297_v18  ;;  %v309_v37 = vmul.f32 0.25, %v289_v34 }
  0x1f   : > { %v300_v21 = vmul.f32 %v299_v20, %v298_v19 }
  0x21   : > { %548 = vrsqrt.f32 %v300_v21  ;;  %vm303_vm1 = vcmp.eq.f32.partialorder %v300_v21, inf  ;;  %v306_v25 = vand.u32 2147483648, %v300_v21  ;;  %vm305_vm2 = vcmp.eq.f32.partialorder %v300_v21, 0.0 }
  0x2b   : > { %v549_v24 = vpop.eup %548 }
  0x2c   : > { %v302_v26 = vmul.f32 %v549_v24, %v300_v21 }
  0x2e   : > { %v304_v29 = vsel %vm303_vm1, %v300_v21, %v302_v26 }
  0x2f   : > { %v307_v30 = vsel %vm305_vm2, %v306_v25, %v304_v29 }
  0x30   : > { %v308_v31 = vadd.f32 1e-05, %v307_v30 }
  0x32   : > { %550 = vrcp.f32 %v308_v31 }
  0x3c   : > { %v551_v40 = vpop.eup %550 }
  0x3d   : > { %v311_v41 = vmul.f32 %v551_v40, %v309_v37 }
  0x3f   : > { %v313_v43 = vsub.f32 1.0, %v311_v41  ;;  %v337_v44 = vand.u32 2147483647, %v311_v41  ;;  %vm361_vm5 = vcmp.ge.f32.partialorder %v311_v41, 0.0 }
  0x41   : > { %v321_v45 = vrot.slane %v313_v43, %v320_v42  ;;  %v338_v46 = vmul.f32 -0.0012624911, %v337_v44  ;;  %v352_v48 = vsub.f32 1.0, %v337_v44 }
  0x43   : > { %v328_v49 = vrot.slane %v321_v45, %v320_v42  ;;  %v339_v50 = vadd.f32 0.00667009, %v338_v46  ;;  %552 = vrsqrt.f32 %v352_v48  ;;  %vm355_vm3 = vcmp.eq.f32.partialorder %v352_v48, inf }
  0x44   : > { %v358_v63 = vand.u32 2147483648, %v352_v48  ;;  %vm357_vm4 = vcmp.eq.f32.partialorder %v352_v48, 0.0 }
  0x45   : > { %v330_v51 = vadd.f32 %v328_v49, %v312_v47  ;;  %v340_v52 = vmul.f32 %v339_v50, %v337_v44 }
  0x47   : > { %335 = vst.msk [vmem:[%s631_s26] sm:$0x3] %vm618_vm0, %v330_v51  ;;  %v341_v53 = vadd.f32 -0.017088126, %v340_v52 }
  0x49   : > { %v342_v54 = vmul.f32 %v341_v53, %v337_v44 }
  0x4b   : > { %v343_v55 = vadd.f32 0.03089188, %v342_v54 }
  0x4d   : > { %v344_v56 = vmul.f32 %v343_v55, %v337_v44  ;;  %v553_v58 = vpop.eup %552 }
  0x4e   : > { %v354_v61 = vmul.f32 %v553_v58, %v352_v48 }
  0x4f   : > { %v345_v57 = vadd.f32 -0.050174303, %v344_v56 }
  0x50   : > { %v356_v2 = vsel %vm355_vm3, %v352_v48, %v354_v61 }
  0x51   : > { %v346_v59 = vmul.f32 %v345_v57, %v337_v44  ;;  %v359_v4 = vsel %vm357_vm4, %v358_v63, %v356_v2 }
  0x53   : > { %v347_v60 = vadd.f32 0.08897899, %v346_v59 }
  0x55   : > { %v348_v62 = vmul.f32 %v347_v60, %v337_v44 }
  0x57   : > { %v349_v0 = vadd.f32 -0.2145988, %v348_v62 }
  0x59   : > { %v350_v3 = vmul.f32 %v349_v0, %v337_v44 }
  0x5b   : > { %v351_v5 = vadd.f32 1.5707963, %v350_v3 }
  0x5d   : > { %v360_v6 = vmul.f32 %v359_v4, %v351_v5 }
  0x5f   : > { %v362_v7 = vsub.f32 3.1415927, %v360_v6 }
  0x61   : > { %v363_v8 = vsel %vm361_vm5, %v360_v6, %v362_v7 }
  0x62   : > { %v371_v9 = vrot.slane %v363_v8, %v320_v42 }
  0x64   : > { %v378_v11 = vrot.slane %v371_v9, %v320_v42 }
  0x66   : > { %v380_v12 = vadd.f32 %v378_v11, %v336_v10 }
  0x68   : > { %381 = vst.msk [vmem:[%s636_s29] sm:$0x3] %vm618_vm0, %v380_v12 }
  0x69 PF: > { %s14_s14 = sadd.s32 1, %s576_s14   ;;  %s667_s12 = smov %s572_s13 }
  0x6a   : > { %p11_p5 = scmp.ge.s32.totalorder %s14_s14, 4   ;;  %s668_s13 = smov %s670_s15 }
  0x6c   :  { %13 = sbr.rel (!%p11_p5) target bundleno = 2 (0x2), region = 77 }

</bundles_post_ra>
